<compile_context>
chip_gen: v7x
topology: tpu7x:2x2x1
jax: 0.10.0
libtpu: 0.0.40
codegen_flags: <defaults>
</compile_context>

<pallas_src>
import functools

import jax
import jax.numpy as jnp
from jax import lax
from jax.experimental import pallas as pl
from jax.experimental.pallas import tpu as pltpu

BN_EPS = 1e-3  # nn.BatchNorm2d(eps=0.001)


def _round_up(x, m):
    return ((x + m - 1) // m) * m


def _choose_tile(m_valid, target=1024):
    """Lane-aligned tile size; prefer an even tile count (v7x has 2 TCs)."""
    tm = min(target, _round_up(m_valid, 128))
    nt = -(-m_valid // tm)
    if nt > 1 and nt % 2 == 1:
        tm_alt = _round_up(-(-m_valid // (nt + 1)), 128)
        nt_alt = -(-m_valid // tm_alt)
        if nt_alt % 2 == 0:
            tm, nt = tm_alt, nt_alt
    return tm, nt


# ----------------------------- Pallas kernels ------------------------------

def _conv_tile(x_ref, w_ref, col_ref, *, C2, Wp, tm, halo):
    """Fused 4x4 conv for one M-tile.

    Builds the (16*C2, tm) im2col block in a bf16 VMEM scratch from 16 static
    lane shifts of one lane-aligned window, then runs a single MXU matmul with
    f32 accumulation.  Returns acc[NP, tm] (f32).
    """
    t = pl.program_id(0)
    base = pl.multiple_of(t * tm, 128)                      # tm % 128 == 0
    win = x_ref[:, pl.ds(base, tm + halo)]                  # aligned [C2, tm+halo] bf16
    for kh in range(4):
        for kw in range(4):
            off = kh * Wp + kw                              # static tap offset
            row0 = (kh * 4 + kw) * C2
            col_ref[row0:row0 + C2, :] = win[:, off:off + tm]
    # one K = 16*C2 contraction on the MXU (fills v5e's 128-deep array at C2=8)
    return jnp.dot(w_ref[...], col_ref[...], preferred_element_type=jnp.float32)


def _stats_kernel(x_ref, w_ref, sum_ref, sq_ref, col_ref, *,
                  C2, Wp, Hp, Wo, Ho, m_valid, tm, halo):
    """Pass 1: per-tile masked BN partial statistics (stats-only, no conv store)."""
    acc = _conv_tile(x_ref, w_ref, col_ref, C2=C2, Wp=Wp, tm=tm, halo=halo)

    # In-kernel validity mask: col = flattened padded position.  Float div/floor
    # is exact for col < 2^23, avoiding vector integer div/rem.
    t = pl.program_id(0)
    col = (t * tm + lax.broadcasted_iota(jnp.int32, (1, tm), 1)).astype(jnp.float32)
    row = jnp.floor(col / float(Wp))                        # b*Hp + i
    jj = col - row * float(Wp)                              # j within padded row
    img = jnp.floor(row / float(Hp))
    ii = row - img * float(Hp)                              # i within padded image
    valid = (col < float(m_valid)) & (jj < float(Wo)) & (ii < float(Ho))
    m = jnp.where(valid, jnp.float32(1.0), jnp.float32(0.0))

    am = acc * m
    sum_ref[0] = jnp.sum(am, axis=1, keepdims=True)         # [NP, 1]
    sq_ref[0] = jnp.sum(am * acc, axis=1, keepdims=True)    # [NP, 1]


def _apply_kernel(x_ref, w_ref, scale_ref, shift_ref, slope_ref, o_ref, col_ref, *,
                  C2, Wp, tm, halo):
    """Pass 2: recompute fused conv, apply BN scale/shift + PReLU, store final."""
    acc = _conv_tile(x_ref, w_ref, col_ref, C2=C2, Wp=Wp, tm=tm, halo=halo)
    y = acc * scale_ref[...] + shift_ref[...]
    o_ref[...] = jnp.where(y > 0.0, y, slope_ref[...] * y)


def conv_stats_pallas(x2, w_r, *, NP, C2, Wp, Hp, Wo, Ho, m_valid, tm, halo,
                      num_tiles, vmem_limit):
    K = 16 * C2
    mx = x2.shape[1]
    kern = functools.partial(_stats_kernel, C2=C2, Wp=Wp, Hp=Hp, Wo=Wo, Ho=Ho,
                             m_valid=m_valid, tm=tm, halo=halo)
    return pl.pallas_call(
        kern,
        grid=(num_tiles,),
        in_specs=[
            pl.BlockSpec((C2, mx), lambda t: (0, 0)),        # resident activation bf16
            pl.BlockSpec((NP, K), lambda t: (0, 0)),         # resident weight bf16
        ],
        out_specs=(
            pl.BlockSpec((1, NP, 1), lambda t: (t, 0, 0)),   # per-tile sum
            pl.BlockSpec((1, NP, 1), lambda t: (t, 0, 0)),   # per-tile sum of sq
        ),
        out_shape=(
            jax.ShapeDtypeStruct((num_tiles, NP, 1), jnp.float32),
            jax.ShapeDtypeStruct((num_tiles, NP, 1), jnp.float32),
        ),
        scratch_shapes=[pltpu.VMEM((K, tm), jnp.bfloat16)],  # im2col block
        compiler_params=pltpu.CompilerParams(
            dimension_semantics=("parallel",),
            vmem_limit_bytes=vmem_limit),
    )(x2, w_r)


def conv_bn_prelu_pallas(x2, w_r, scale, shift, slope, *, NP, C2, Wp, tm, halo,
                         num_tiles, mf, vmem_limit):
    K = 16 * C2
    mx = x2.shape[1]
    kern = functools.partial(_apply_kernel, C2=C2, Wp=Wp, tm=tm, halo=halo)
    return pl.pallas_call(
        kern,
        grid=(num_tiles,),
        in_specs=[
            pl.BlockSpec((C2, mx), lambda t: (0, 0)),
            pl.BlockSpec((NP, K), lambda t: (0, 0)),
            pl.BlockSpec((NP, 1), lambda t: (0, 0)),
            pl.BlockSpec((NP, 1), lambda t: (0, 0)),
            pl.BlockSpec((NP, 1), lambda t: (0, 0)),
        ],
        out_specs=pl.BlockSpec((NP, tm), lambda t: (0, t)),  # lane-dense output tile
        out_shape=jax.ShapeDtypeStruct((NP, mf), jnp.float32),
        scratch_shapes=[pltpu.VMEM((K, tm), jnp.bfloat16)],
        compiler_params=pltpu.CompilerParams(
            dimension_semantics=("parallel",),
            vmem_limit_bytes=vmem_limit),
    )(x2, w_r, scale, shift, slope)


# ------------------------------- JAX glue -----------------------------------

def nearest_upsample(x, out_h, out_w):
    # nn.Upsample(mode='nearest'): src = floor(dst * in/out)  (exact integer form)
    B, C, H, W = x.shape
    rows = (jnp.arange(out_h) * H) // out_h
    cols = (jnp.arange(out_w) * W) // out_w
    return x[:, :, rows[:, None], cols[None, :]]


def gated_deconv_forward(params, inputs, skip_input, y, size, *, tm_target=1024):
    B, in_ch, _, _ = inputs.shape
    out_ch = params["w_conv"].shape[0]
    C2 = 2 * in_ch

    # gate FC + sigmoid, gated skip, concat, nearest upsample, ZeroPad2d:
    # cheap memory-bound prep left to XLA.
    # TODO(synk): fuse this prep + epilogue into the conv kernel's index_maps.
    prob = jax.nn.sigmoid(y @ params["wg"] + params["bg"]).reshape(B, 1, size, size)
    x = jnp.concatenate([inputs, skip_input * prob], axis=1)          # [B, C2, s, s]
    up = 2 * size - 2
    x = nearest_upsample(x, up, up)
    x = jnp.pad(x, ((0, 0), (0, 0), (2, 3), (2, 3)))                  # [B, C2, Hp, Wp]
    Hp, Wp = x.shape[2], x.shape[3]
    Ho, Wo = Hp - 3, Wp - 3

    # channel-major flattened layout so M = B*Hp*Wp sits on lanes
    m_valid = B * Hp * Wp
    tm, num_tiles = _choose_tile(m_valid, tm_target)
    mf = num_tiles * tm
    halo = _round_up(3 * Wp + 4, 128)
    mx = mf + halo

    x_flat = x.transpose(1, 0, 2, 3).reshape(C2, m_valid)
    x2 = jnp.pad(x_flat, ((0, 0), (0, mx - m_valid))).astype(jnp.bfloat16)

    # weight [out_ch, C2, 4, 4] -> [NP, 16*C2], K ordered (kh, kw, c), bf16
    NP = _round_up(out_ch, 8)
    K = 16 * C2
    w_r = params["w_conv"].transpose(0, 2, 3, 1).reshape(out_ch, K)
    w_r = jnp.pad(w_r, ((0, NP - out_ch), (0, 0))).astype(jnp.bfloat16)

    # VMEM budget from the actual footprint (resident x + weight double-buffered,
    # im2col scratch, window temp, output tiles), 2x headroom, v7x 64 MiB ceiling.
    est = (2 * C2 * mx * 2 + 2 * NP * K * 2 + K * tm * 2
           + C2 * (tm + halo) * 2 + 3 * NP * tm * 4)
    vmem_limit = int(min(max(2 * est, 16 * 2 ** 20), 64 * 2 ** 20))

    # pass 1: per-tile masked BN partials (stats-only)
    sums, sqs = conv_stats_pallas(
        x2, w_r, NP=NP, C2=C2, Wp=Wp, Hp=Hp, Wo=Wo, Ho=Ho, m_valid=m_valid,
        tm=tm, halo=halo, num_tiles=num_tiles, vmem_limit=vmem_limit)

    # combine BN partials (training-mode biased stats) -> per-channel scale/shift
    cnt = float(B * Ho * Wo)
    s1 = jnp.sum(sums[:, :out_ch, 0], axis=0)
    s2 = jnp.sum(sqs[:, :out_ch, 0], axis=0)
    mean = s1 / cnt
    var = jnp.maximum(s2 / cnt - mean * mean, 0.0)
    inv = lax.rsqrt(var + BN_EPS)
    scale = params["gamma"].reshape(-1) * inv
    shift = params["beta"].reshape(-1) - mean * scale
    scale = jnp.pad(scale, (0, NP - out_ch)).reshape(NP, 1)
    shift = jnp.pad(shift, (0, NP - out_ch)).reshape(NP, 1)
    slope = jnp.broadcast_to(params["prelu_a"].reshape(1, 1), (NP, 1)).astype(jnp.float32)

    # pass 2: recompute conv + BN + PReLU fused, lane-dense final store
    out_flat = conv_bn_prelu_pallas(
        x2, w_r, scale, shift, slope, NP=NP, C2=C2, Wp=Wp, tm=tm, halo=halo,
        num_tiles=num_tiles, mf=mf, vmem_limit=vmem_limit)

    # small epilogue on the final output only: crop valid columns, back to NCHW
    out = out_flat[:out_ch, :m_valid].reshape(out_ch, B, Hp, Wp)
    return out[:, :, :Ho, :Wo].transpose(1, 0, 2, 3)


# --------------------------- pure-JAX reference ------------------------------

def reference_forward(params, inputs, skip_input, y, size):
    B = inputs.shape[0]
    prob = jax.nn.sigmoid(y @ params["wg"] + params["bg"]).reshape(B, 1, size, size)
    gated = skip_input * prob
    x = jnp.concatenate([inputs, gated], axis=1)
    x = nearest_upsample(x, 2 * size - 2, 2 * size - 2)
    x = jnp.pad(x, ((0, 0), (0, 0), (2, 3), (2, 3)))
    # match the kernel's bf16 MXU inputs (f32 accumulation)
    xq = x.astype(jnp.bfloat16).astype(jnp.float32)
    wq = params["w_conv"].astype(jnp.bfloat16).astype(jnp.float32)
    conv = jax.lax.conv_general_dilated(
        xq, wq, (1, 1), "VALID", dimension_numbers=("NCHW", "OIHW", "NCHW"))
    mean = conv.mean(axis=(0, 2, 3), keepdims=True)
    var = ((conv - mean) ** 2).mean(axis=(0, 2, 3), keepdims=True)
    xhat = (conv - mean) * jax.lax.rsqrt(var + BN_EPS)
    ybn = xhat * params["gamma"].reshape(1, -1, 1, 1) + params["beta"].reshape(1, -1, 1, 1)
    a = params["prelu_a"][0]
    return jnp.where(ybn > 0, ybn, a * ybn)


# --------------------------------- main --------------------------------------

if __name__ == "__main__":
    B, in_ch, out_ch, size, n_class = 2, 4, 4, 16, 6

    key = jax.random.PRNGKey(0)
    k = jax.random.split(key, 8)

    inputs = jax.random.normal(k[0], (B, in_ch, size, size), jnp.float32)
    skip_input = jax.random.normal(k[1], (B, in_ch, size, size), jnp.float32)
    y = jax.random.normal(k[2], (B, n_class), jnp.float32)

    # Parameters (mirroring the module's __init__):
    #   Linear(n_class, size*size): default-style uniform init (not a 'Conv').
    bound = 1.0 / jnp.sqrt(n_class)
    wg = jax.random.uniform(k[3], (n_class, size * size), jnp.float32, -bound, bound)
    bg = jax.random.uniform(k[4], (1, size * size), jnp.float32, -bound, bound)
    #   Conv2d(in_ch*2, out_ch, 4, bias=False): gaussian_weights_init -> N(0, 0.02)
    w_conv = 0.02 * jax.random.normal(k[5], (out_ch, 2 * in_ch, 4, 4), jnp.float32)
    #   BatchNorm2d defaults: gamma=1, beta=0 ; PReLU(init=0.0) (single parameter)
    gamma = jnp.ones((1, out_ch), jnp.float32)
    beta = jnp.zeros((1, out_ch), jnp.float32)
    prelu_a = jnp.zeros((1,), jnp.float32)

    params = dict(wg=wg, bg=bg, w_conv=w_conv, gamma=gamma, beta=beta, prelu_a=prelu_a)

    out = gated_deconv_forward(params, inputs, skip_input, y, size)
    out = jax.block_until_ready(out)
    assert out.shape == (B, out_ch, 2 * size, 2 * size), out.shape

    ref = jax.block_until_ready(reference_forward(params, inputs, skip_input, y, size))
    err = float(jnp.max(jnp.abs(out - ref)))
    assert err < 5e-3, f"max abs error vs reference: {err}"

    print("KERNEL_OK")
</pallas_src>

<mosaic_0001>
module attributes {stable_mosaic.version = 11 : i64} {
  func.func @_stats_kernel(%arg0: i32, %arg1: memref<8x2688xbf16, #tpu.memory_space<vmem>>, %arg2: memref<8x128xbf16, #tpu.memory_space<vmem>>, %arg3: memref<1x8x1xf32, #tpu.memory_space<vmem>>, %arg4: memref<1x8x1xf32, #tpu.memory_space<vmem>>, %arg5: memref<128x640xbf16, #tpu.memory_space<vmem>>) attributes {dimension_semantics = [#tpu.dimension_semantics<parallel>], iteration_bounds = array<i64: 4>, scalar_prefetch = 0 : i64, scratch_operands = 1 : i64, tpu.core_type = #tpu.core_type<tc>, window_params = [{pipeline_mode = #tpu.pipeline_mode<synchronous>, transform_indices = @transform_0, window_bounds = array<i64: 8, 2688>}, {pipeline_mode = #tpu.pipeline_mode<synchronous>, transform_indices = @transform_1, window_bounds = array<i64: 8, 128>}, {transform_indices = @transform_2, window_bounds = array<i64: 1, 8, 1>}, {transform_indices = @transform_3, window_bounds = array<i64: 1, 8, 1>}]} {
    %c640_i32 = arith.constant 640 : i32
    %0 = arith.muli %arg0, %c640_i32 : i32
    %1 = tpu.assume_multiple %0, 128 : i32
    %c0 = arith.constant 0 : index
    %2 = arith.index_cast %1 : i32 to index
    %3 = vector.load %arg1[%c0, %2] : memref<8x2688xbf16, #tpu.memory_space<vmem>>, vector<8x768xbf16>
    %4 = vector.extract_strided_slice %3 {offsets = [0, 0], sizes = [8, 640], strides = [1, 1]} : vector<8x768xbf16> to vector<8x640xbf16>
    %c0_0 = arith.constant 0 : index
    %c0_1 = arith.constant 0 : index
    %5 = vector.load %arg5[%c0_0, %c0_1] : memref<128x640xbf16, #tpu.memory_space<vmem>>, vector<8x640xbf16>
    tpu.vector_store %arg5[%c0_0, %c0_1], %4 {strides = array<i32>} : memref<128x640xbf16, #tpu.memory_space<vmem>>, vector<8x640xbf16>,
    %6 = vector.extract_strided_slice %3 {offsets = [0, 1], sizes = [8, 640], strides = [1, 1]} : vector<8x768xbf16> to vector<8x640xbf16>
    %c8 = arith.constant 8 : index
    %c0_2 = arith.constant 0 : index
    %7 = vector.load %arg5[%c8, %c0_2] : memref<128x640xbf16, #tpu.memory_space<vmem>>, vector<8x640xbf16>
    tpu.vector_store %arg5[%c8, %c0_2], %6 {strides = array<i32>} : memref<128x640xbf16, #tpu.memory_space<vmem>>, vector<8x640xbf16>,
    %8 = vector.extract_strided_slice %3 {offsets = [0, 2], sizes = [8, 640], strides = [1, 1]} : vector<8x768xbf16> to vector<8x640xbf16>
    %c16 = arith.constant 16 : index
    %c0_3 = arith.constant 0 : index
    %9 = vector.load %arg5[%c16, %c0_3] : memref<128x640xbf16, #tpu.memory_space<vmem>>, vector<8x640xbf16>
    tpu.vector_store %arg5[%c16, %c0_3], %8 {strides = array<i32>} : memref<128x640xbf16, #tpu.memory_space<vmem>>, vector<8x640xbf16>,
    %10 = vector.extract_strided_slice %3 {offsets = [0, 3], sizes = [8, 640], strides = [1, 1]} : vector<8x768xbf16> to vector<8x640xbf16>
    %c24 = arith.constant 24 : index
    %c0_4 = arith.constant 0 : index
    %11 = vector.load %arg5[%c24, %c0_4] : memref<128x640xbf16, #tpu.memory_space<vmem>>, vector<8x640xbf16>
    tpu.vector_store %arg5[%c24, %c0_4], %10 {strides = array<i32>} : memref<128x640xbf16, #tpu.memory_space<vmem>>, vector<8x640xbf16>,
    %12 = vector.extract_strided_slice %3 {offsets = [0, 35], sizes = [8, 640], strides = [1, 1]} : vector<8x768xbf16> to vector<8x640xbf16>
    %c32 = arith.constant 32 : index
    %c0_5 = arith.constant 0 : index
    %13 = vector.load %arg5[%c32, %c0_5] : memref<128x640xbf16, #tpu.memory_space<vmem>>, vector<8x640xbf16>
    tpu.vector_store %arg5[%c32, %c0_5], %12 {strides = array<i32>} : memref<128x640xbf16, #tpu.memory_space<vmem>>, vector<8x640xbf16>,
    %14 = vector.extract_strided_slice %3 {offsets = [0, 36], sizes = [8, 640], strides = [1, 1]} : vector<8x768xbf16> to vector<8x640xbf16>
    %c40 = arith.constant 40 : index
    %c0_6 = arith.constant 0 : index
    %15 = vector.load %arg5[%c40, %c0_6] : memref<128x640xbf16, #tpu.memory_space<vmem>>, vector<8x640xbf16>
    tpu.vector_store %arg5[%c40, %c0_6], %14 {strides = array<i32>} : memref<128x640xbf16, #tpu.memory_space<vmem>>, vector<8x640xbf16>,
    %16 = vector.extract_strided_slice %3 {offsets = [0, 37], sizes = [8, 640], strides = [1, 1]} : vector<8x768xbf16> to vector<8x640xbf16>
    %c48 = arith.constant 48 : index
    %c0_7 = arith.constant 0 : index
    %17 = vector.load %arg5[%c48, %c0_7] : memref<128x640xbf16, #tpu.memory_space<vmem>>, vector<8x640xbf16>
    tpu.vector_store %arg5[%c48, %c0_7], %16 {strides = array<i32>} : memref<128x640xbf16, #tpu.memory_space<vmem>>, vector<8x640xbf16>,
    %18 = vector.extract_strided_slice %3 {offsets = [0, 38], sizes = [8, 640], strides = [1, 1]} : vector<8x768xbf16> to vector<8x640xbf16>
    %c56 = arith.constant 56 : index
    %c0_8 = arith.constant 0 : index
    %19 = vector.load %arg5[%c56, %c0_8] : memref<128x640xbf16, #tpu.memory_space<vmem>>, vector<8x640xbf16>
    tpu.vector_store %arg5[%c56, %c0_8], %18 {strides = array<i32>} : memref<128x640xbf16, #tpu.memory_space<vmem>>, vector<8x640xbf16>,
    %20 = vector.extract_strided_slice %3 {offsets = [0, 70], sizes = [8, 640], strides = [1, 1]} : vector<8x768xbf16> to vector<8x640xbf16>
    %c64 = arith.constant 64 : index
    %c0_9 = arith.constant 0 : index
    %21 = vector.load %arg5[%c64, %c0_9] : memref<128x640xbf16, #tpu.memory_space<vmem>>, vector<8x640xbf16>
    tpu.vector_store %arg5[%c64, %c0_9], %20 {strides = array<i32>} : memref<128x640xbf16, #tpu.memory_space<vmem>>, vector<8x640xbf16>,
    %22 = vector.extract_strided_slice %3 {offsets = [0, 71], sizes = [8, 640], strides = [1, 1]} : vector<8x768xbf16> to vector<8x640xbf16>
    %c72 = arith.constant 72 : index
    %c0_10 = arith.constant 0 : index
    %23 = vector.load %arg5[%c72, %c0_10] : memref<128x640xbf16, #tpu.memory_space<vmem>>, vector<8x640xbf16>
    tpu.vector_store %arg5[%c72, %c0_10], %22 {strides = array<i32>} : memref<128x640xbf16, #tpu.memory_space<vmem>>, vector<8x640xbf16>,
    %24 = vector.extract_strided_slice %3 {offsets = [0, 72], sizes = [8, 640], strides = [1, 1]} : vector<8x768xbf16> to vector<8x640xbf16>
    %c80 = arith.constant 80 : index
    %c0_11 = arith.constant 0 : index
    %25 = vector.load %arg5[%c80, %c0_11] : memref<128x640xbf16, #tpu.memory_space<vmem>>, vector<8x640xbf16>
    tpu.vector_store %arg5[%c80, %c0_11], %24 {strides = array<i32>} : memref<128x640xbf16, #tpu.memory_space<vmem>>, vector<8x640xbf16>,
    %26 = vector.extract_strided_slice %3 {offsets = [0, 73], sizes = [8, 640], strides = [1, 1]} : vector<8x768xbf16> to vector<8x640xbf16>
    %c88 = arith.constant 88 : index
    %c0_12 = arith.constant 0 : index
    %27 = vector.load %arg5[%c88, %c0_12] : memref<128x640xbf16, #tpu.memory_space<vmem>>, vector<8x640xbf16>
    tpu.vector_store %arg5[%c88, %c0_12], %26 {strides = array<i32>} : memref<128x640xbf16, #tpu.memory_space<vmem>>, vector<8x640xbf16>,
    %28 = vector.extract_strided_slice %3 {offsets = [0, 105], sizes = [8, 640], strides = [1, 1]} : vector<8x768xbf16> to vector<8x640xbf16>
    %c96 = arith.constant 96 : index
    %c0_13 = arith.constant 0 : index
    %29 = vector.load %arg5[%c96, %c0_13] : memref<128x640xbf16, #tpu.memory_space<vmem>>, vector<8x640xbf16>
    tpu.vector_store %arg5[%c96, %c0_13], %28 {strides = array<i32>} : memref<128x640xbf16, #tpu.memory_space<vmem>>, vector<8x640xbf16>,
    %30 = vector.extract_strided_slice %3 {offsets = [0, 106], sizes = [8, 640], strides = [1, 1]} : vector<8x768xbf16> to vector<8x640xbf16>
    %c104 = arith.constant 104 : index
    %c0_14 = arith.constant 0 : index
    %31 = vector.load %arg5[%c104, %c0_14] : memref<128x640xbf16, #tpu.memory_space<vmem>>, vector<8x640xbf16>
    tpu.vector_store %arg5[%c104, %c0_14], %30 {strides = array<i32>} : memref<128x640xbf16, #tpu.memory_space<vmem>>, vector<8x640xbf16>,
    %32 = vector.extract_strided_slice %3 {offsets = [0, 107], sizes = [8, 640], strides = [1, 1]} : vector<8x768xbf16> to vector<8x640xbf16>
    %c112 = arith.constant 112 : index
    %c0_15 = arith.constant 0 : index
    %33 = vector.load %arg5[%c112, %c0_15] : memref<128x640xbf16, #tpu.memory_space<vmem>>, vector<8x640xbf16>
    tpu.vector_store %arg5[%c112, %c0_15], %32 {strides = array<i32>} : memref<128x640xbf16, #tpu.memory_space<vmem>>, vector<8x640xbf16>,
    %34 = vector.extract_strided_slice %3 {offsets = [0, 108], sizes = [8, 640], strides = [1, 1]} : vector<8x768xbf16> to vector<8x640xbf16>
    %c120 = arith.constant 120 : index
    %c0_16 = arith.constant 0 : index
    %35 = vector.load %arg5[%c120, %c0_16] : memref<128x640xbf16, #tpu.memory_space<vmem>>, vector<8x640xbf16>
    tpu.vector_store %arg5[%c120, %c0_16], %34 {strides = array<i32>} : memref<128x640xbf16, #tpu.memory_space<vmem>>, vector<8x640xbf16>,
    %c0_17 = arith.constant 0 : index
    %c0_18 = arith.constant 0 : index
    %36 = vector.load %arg2[%c0_17, %c0_18] : memref<8x128xbf16, #tpu.memory_space<vmem>>, vector<8x128xbf16>
    %c0_19 = arith.constant 0 : index
    %c0_20 = arith.constant 0 : index
    %37 = vector.load %arg5[%c0_19, %c0_20] : memref<128x640xbf16, #tpu.memory_space<vmem>>, vector<128x640xbf16>
    %cst = arith.constant dense<0.000000e+00> : vector<8x640xf32>
    %38 = tpu.matmul %36, %37, %cst {dimension_numbers = #tpu.dot_dimension_numbers<[1], [0], [0], [1], [0, 0, 1, 1], [], []>} : vector<8x128xbf16>, vector<128x640xbf16>, vector<8x640xf32> -> vector<8x640xf32>
    %c640_i32_21 = arith.constant 640 : i32
    %39 = arith.muli %arg0, %c640_i32_21 : i32
    %40 = tpu.iota {dimensions = array<i32: 1>} : vector<1x640xi32>
    %41 = vector.broadcast %39 : i32 to vector<1x640xi32>
    %42 = arith.addi %41, %40 : vector<1x640xi32>
    %43 = arith.sitofp %42 : vector<1x640xi32> to vector<1x640xf32>
    %cst_22 = arith.constant 3.500000e+01 : f32
    %44 = vector.broadcast %cst_22 : f32 to vector<1x640xf32>
    %45 = arith.divf %43, %44 : vector<1x640xf32>
    %46 = math.floor %45 : vector<1x640xf32>
    %cst_23 = arith.constant 3.500000e+01 : f32
    %47 = vector.broadcast %cst_23 : f32 to vector<1x640xf32>
    %48 = arith.mulf %46, %47 : vector<1x640xf32>
    %49 = arith.subf %43, %48 : vector<1x640xf32>
    %cst_24 = arith.constant 3.500000e+01 : f32
    %50 = vector.broadcast %cst_24 : f32 to vector<1x640xf32>
    %51 = arith.divf %46, %50 : vector<1x640xf32>
    %52 = math.floor %51 : vector<1x640xf32>
    %cst_25 = arith.constant 3.500000e+01 : f32
    %53 = vector.broadcast %cst_25 : f32 to vector<1x640xf32>
    %54 = arith.mulf %52, %53 : vector<1x640xf32>
    %55 = arith.subf %46, %54 : vector<1x640xf32>
    %cst_26 = arith.constant 2.450000e+03 : f32
    %56 = vector.broadcast %cst_26 : f32 to vector<1x640xf32>
    %57 = arith.cmpf olt, %43, %56 : vector<1x640xf32>
    %cst_27 = arith.constant 3.200000e+01 : f32
    %58 = vector.broadcast %cst_27 : f32 to vector<1x640xf32>
    %59 = arith.cmpf olt, %49, %58 : vector<1x640xf32>
    %60 = arith.andi %57, %59 : vector<1x640xi1>
    %cst_28 = arith.constant 3.200000e+01 : f32
    %61 = vector.broadcast %cst_28 : f32 to vector<1x640xf32>
    %62 = arith.cmpf olt, %55, %61 : vector<1x640xf32>
    %63 = arith.andi %60, %62 : vector<1x640xi1>
    %cst_29 = arith.constant 1.000000e+00 : f32
    %cst_30 = arith.constant 0.000000e+00 : f32
    %64 = vector.broadcast %cst_29 : f32 to vector<1x640xf32>
    %65 = vector.broadcast %cst_30 : f32 to vector<1x640xf32>
    %66 = arith.select %63, %64, %65 : vector<1x640xi1>, vector<1x640xf32>
    %67 = vector.broadcast %66 : vector<1x640xf32> to vector<8x640xf32>
    %68 = arith.mulf %38, %67 : vector<8x640xf32>
    %cst_31 = arith.constant dense<0.000000e+00> : vector<8xf32>
    %69 = vector.multi_reduction <add>, %68, %cst_31 [1] : vector<8x640xf32> to vector<8xf32>
    %70 = vector.shape_cast %69 : vector<8xf32> to vector<8x1xf32>
    %c0_32 = arith.constant 0 : index
    %c0_33 = arith.constant 0 : index
    %c0_34 = arith.constant 0 : index
    %71 = vector.load %arg3[%c0_32, %c0_33, %c0_34] : memref<1x8x1xf32, #tpu.memory_space<vmem>>, vector<1x8x1xf32>
    %72 = vector.shape_cast %71 : vector<1x8x1xf32> to vector<8x1xf32>
    %73 = vector.shape_cast %70 : vector<8x1xf32> to vector<1x8x1xf32>
    tpu.vector_store %arg3[%c0_32, %c0_33, %c0_34], %73 {strides = array<i32>} : memref<1x8x1xf32, #tpu.memory_space<vmem>>, vector<1x8x1xf32>,
    %74 = arith.mulf %68, %38 : vector<8x640xf32>
    %cst_35 = arith.constant dense<0.000000e+00> : vector<8xf32>
    %75 = vector.multi_reduction <add>, %74, %cst_35 [1] : vector<8x640xf32> to vector<8xf32>
    %76 = vector.shape_cast %75 : vector<8xf32> to vector<8x1xf32>
    %c0_36 = arith.constant 0 : index
    %c0_37 = arith.constant 0 : index
    %c0_38 = arith.constant 0 : index
    %77 = vector.load %arg4[%c0_36, %c0_37, %c0_38] : memref<1x8x1xf32, #tpu.memory_space<vmem>>, vector<1x8x1xf32>
    %78 = vector.shape_cast %77 : vector<1x8x1xf32> to vector<8x1xf32>
    %79 = vector.shape_cast %76 : vector<8x1xf32> to vector<1x8x1xf32>
    tpu.vector_store %arg4[%c0_36, %c0_37, %c0_38], %79 {strides = array<i32>} : memref<1x8x1xf32, #tpu.memory_space<vmem>>, vector<1x8x1xf32>,
    return
  }
  func.func @transform_0(%arg0: i32) -> (i32, i32) {
    %c0_i32 = arith.constant 0 : i32
    %c0_i32_0 = arith.constant 0 : i32
    %c0_i32_1 = arith.constant 0 : i32
    return %c0_i32, %c0_i32_0 : i32, i32
  }
  func.func @transform_1(%arg0: i32) -> (i32, i32) {
    %c0_i32 = arith.constant 0 : i32
    %c0_i32_0 = arith.constant 0 : i32
    %c0_i32_1 = arith.constant 0 : i32
    return %c0_i32, %c0_i32_0 : i32, i32
  }
  func.func @transform_2(%arg0: i32) -> (i32, i32, i32) {
    %c0_i32 = arith.constant 0 : i32
    %c0_i32_0 = arith.constant 0 : i32
    %c0_i32_1 = arith.constant 0 : i32
    return %arg0, %c0_i32, %c0_i32_0 : i32, i32, i32
  }
  func.func @transform_3(%arg0: i32) -> (i32, i32, i32) {
    %c0_i32 = arith.constant 0 : i32
    %c0_i32_0 = arith.constant 0 : i32
    %c0_i32_1 = arith.constant 0 : i32
    return %arg0, %c0_i32, %c0_i32_0 : i32, i32, i32
  }
}

</mosaic_0001>

<bundles_post_ra>
// kernel: tpu_custom_call.1
= control target key start
LH: loop header
LB: loop body
LE: loop exit
PB: predicated region body
PF: predicated region fallthrough
CT: control target
= control target key end

     0   :  { %9 = vsyncpa [#allocation4], 0  ;;  %s1680_s0 = inlined_call_operand.hbm [shape: bf16[8,2688], index: 0, kind: input, shape index: {}]   ;;  %s1681_s1 = inlined_call_operand.hbm [shape: bf16[8,128], index: 1, kind: input, shape index: {}]   ;;  %s1682_s2 = inlined_call_operand.vmem [shape: f32[4,8,1], index: 2, kind: output, shape index: {0}]   ;;  %s1683_s3 = inlined_call_operand.vmem [shape: f32[4,8,1], index: 3, kind: output, shape index: {1}]  }
   0x1   :  { %10 = vsyncpa [#allocation6], 0  ;;  %s1225_s12 = smov 0  }
   0x2 LB: > { %s1231_s13 = sadd.s32 4294967295, %s1183_s12   ;;  %p1014_p0 = scmp.ge.s32.totalorder %s1183_s12, 1  ;;  %s1183_s12 = sphi %s1225_s12, %s16_s12  }
   0x3   : > { %p115_p1 = scmp.lt.s32.totalorder %s1183_s12, 5  ;;  %p1684_p2 = scmp.eq.s32.totalorder %s1231_s13, 0 }
   0x4   : > { %s1185_s15 = smov [#allocation3]   ;;  %s1186_s17 = smov [#allocation5]  }
   0x5   : > { %p1236_p3 = pnand %p1014_p0, %p115_p1  ;;  %s128_s16 = sshll.u32 %s1185_s15, 4  ;;  %s129_s16 = int_to_ptr.vmem [resolvable:$true] %s128_s16 }
   0x6   : > { %s139_s18 = sshll.u32 %s1186_s17, 4  ;;  %s1113_s22 = scalar_lea.hbm %s1680_s0, 1344  ;;  %s1248_s18 = int_to_ptr.vmem [resolvable:$true] %s139_s18 }
   0x7   : > { %s1686_s14 = scalar_select %p1236_p3, 1, 0 }
   0x8   : > { %p1068_p4 = pneg %p1236_p3  ;;  %p1114_p6 = scmp.ne.s32.totalorder %s1680_s0, %s1113_s22 }
   0x9   : > { %p1120_p10 = scmp.lt.u32.totalorder %s1113_s22, %s1680_s0 }
   0xa   : > { %p1244_p5 = pnand %p1684_p2, %p1068_p4 }
   0xc   : > { %p1115_p7 = pneg %p1244_p5 }
   0xe   : > { %p1116_p8 = pnand %p1115_p7, %p1114_p6 }
  0x10   : > { %p1117_p9 = pneg %p1116_p8 }
  0x12   : > { %p1122_p11 = pnand %p1120_p10, %p1117_p9 }
  0x14   : > { %1125 = shalt.err (!%p1122_p11)
}
  0x15   : > { %s1126_s27 = scalar_lea.vmem %s129_s16, 1344  ;;  %p1134_p1 = scmp.lt.s32.totalorder %s129_s16, %s129_s16 }
  0x16   : > { %p1127_p12 = scmp.ne.s32.totalorder %s129_s16, %s1126_s27  ;;  %p1135_p4 = scmp.lt.s32.totalorder %s1126_s27, %s1126_s27 }
  0x18   : > { %p1129_p13 = pnand %p1127_p12, %p1115_p7  ;;  %p1136_p2 = por %p1135_p4, %p1134_p1 }
  0x1a   : > { %p1130_p0 = pneg %p1129_p13 }
  0x1c   : > { %p1137_p3 = pnand %p1136_p2, %p1130_p0 }
  0x1e   : > { %1140 = shalt.err (!%p1137_p3)
}
  0x1f   : > { %1071 = dma.hbm_to_vmem [thread:$0]  (!%p1244_p5), %s1680_s0, 1344, %s129_s16, [#allocation4]  }
  0x20   : > { %s1141_s5 = scalar_lea.hbm %s1681_s1, 64 }
  0x21   : > { %p1142_p6 = scmp.ne.s32.totalorder %s1681_s1, %s1141_s5  ;;  %p1148_p3 = scmp.lt.u32.totalorder %s1141_s5, %s1681_s1 }
  0x23   : > { %p1144_p8 = pnand %p1142_p6, %p1115_p7 }
  0x25   : > { %p1145_p2 = pneg %p1144_p8 }
  0x27   : > { %p1150_p9 = pnand %p1148_p3, %p1145_p2 }
  0x29   : > { %1153 = shalt.err (!%p1150_p9)
}
  0x2a   : > { %s1154_s10 = scalar_lea.vmem %s1248_s18, 64  ;;  %p1162_p13 = scmp.lt.s32.totalorder %s1248_s18, %s1248_s18 }
  0x2b   : > { %p1155_p10 = scmp.ne.s32.totalorder %s1248_s18, %s1154_s10  ;;  %p1163_p0 = scmp.lt.s32.totalorder %s1154_s10, %s1154_s10 }
  0x2d   : > { %p1157_p11 = pnand %p1155_p10, %p1115_p7  ;;  %p1164_p1 = por %p1163_p0, %p1162_p13 }
  0x2f   : > { %p1158_p12 = pneg %p1157_p11 }
  0x31   : > { %p1165_p4 = pnand %p1164_p1, %p1158_p12 }
  0x33   : > { %1168 = shalt.err (!%p1165_p4)
}
  0x34   : > { %1074 = dma.hbm_to_vmem [thread:$0]  (!%p1244_p5), %s1681_s1, 64, %s1248_s18, [#allocation6]  }
  0x35   : > { %p1688_p6 = scmp.ne.s32.totalorder %s1686_s14, 0 }
  0x36   : > { %p1689_p8 = scmp.eq.s32.totalorder (!%p1688_p6), %s1231_s13, 0 }
  0x37   : > { %152 = sbr.rel (%p1688_p6) target bundleno = 740 (0x2e4), region = 28 }
  0x3e   : > { %1174 = dma.done.wait (%p1689_p8), [#allocation4], 1344   ;;  %p1690_p7 = pmov %p1689_p8 }
  0x40   : > { %1176 = vsyncadd (%p1690_p7), [#allocation4], 4294965952  ;;  %p1691_p2 = pmov %p1690_p7 }
  0x42   : > { %1178 = dma.done.wait (%p1691_p2), [#allocation6], 64   ;;  %p1692_p3 = pmov %p1691_p2 }
  0x43   : > { %s187_s16 = smul.u32 640, %s1231_s13  ;;  %s1187_s19 = smov 127   ;;  %v1202_v9 = vmov 0   ;;  %vm232_vm0 = vcmask 1039360   ;;  %vm260_vm1 = vcmask 1031168   ;;  %vm288_vm2 = vcmask 1022976  }
  0x44   : > { %1180 = vsyncadd (%p1692_p3), [#allocation6], 4294967232  ;;  %s1188_s20 = smov 126   ;;  %s1189_s21 = smov 125   ;;  %713 = vmatprep.mubr.bf16.mxu0 %v1202_v9  ;;  %754 = vmatprep.mubr.bf16.mxu1 %v1202_v9  ;;  %vm316_vm3 = vcmask 760832   ;;  %vm344_vm4 = vcmask 752640  }
  0x45   : > { %s188_s17 = sshra.s32 %s187_s16, 7  ;;  %s1190_s22 = smov 93   ;;  %vm372_vm5 = vcmask 744448   ;;  %vm400_vm6 = vcmask 736256   ;;  %vm428_vm7 = vcmask 474112   ;;  %vm456_vm8 = vcmask 465920  }
  0x46   : > { %s1022_s18 = sshll.u32 %s188_s17, 2  ;;  %s1191_s23 = smov 92   ;;  %vm484_vm9 = vcmask 457728   ;;  %vm512_vm10 = vcmask 449536   ;;  %vm540_vm11 = vcmask 187392   ;;  %vm568_vm12 = vcmask 179200  }
  0x47   : > { %s191_s14 = scalar_lea.vmem [#allocation3], %s1022_s18  ;;  %s1192_s24 = smov 91   ;;  %vm596_vm13 = vcmask 171008   ;;  %vm624_vm14 = vcmask 162816   ;;  %vm1204_vm15 = vmmov 0  }
  0x48   : > { %v192_v0 = vld [vmem:[%s191_s14] sm:$0xff]  ;;  %v193_v1 = vld [vmem:[%s191_s14 + $0x8] sm:$0xff]  ;;  %v1310_v2 = vld [vmem:[%s191_s14 + $0x10] sm:$0xff]  ;;  %s1193_s25 = smov 90   ;;  %s1194_s26 = smov 58  }
  0x49   : > { %v1312_v3 = vcombine.high %v192_v0, %v192_v0  ;;  %v1314_v4 = vcombine.low %v192_v0, %v192_v0  ;;  %v1316_v5 = vcombine.low %v193_v1, %v193_v1  ;;  %v1318_v6 = vcombine.high %v193_v1, %v193_v1  ;;  %s1195_s27 = smov 57   ;;  %s1196_s28 = smov 56  }
  0x4a   : > { %v1322_v7 = vcombine.low %v1310_v2, %v1310_v2  ;;  %s1197_s29 = smov 55   ;;  %s1198_s30 = smov 23   ;;  %v1431_v8 = vcombine.high %v1310_v2, %v1310_v2 }
  0x4b   : > { %222 = vrot.lane.b32.xlu0 %v1312_v3, %s1187_s19  ;;  %214 = vst [vmem:[#allocation2 + $0x8] sm:$0xf] %v1312_v3  ;;  %220 = vrot.lane.b32.xlu1 %v1314_v4, %s1187_s19  ;;  %213 = vst [vmem:[#allocation2] sm:$0xf] %v1314_v4  ;;  %s1199_s4 = smov 22   ;;  %s1200_s5 = smov 21  }
  0x4c   : > { %215 = vst [vmem:[#allocation2 + $0x10] sm:$0xf] %v1316_v5  ;;  %216 = vst [vmem:[#allocation2 + $0x18] sm:$0xf] %v1318_v6  ;;  %s1201_s6 = smov 20   ;;  %p178_p5 = scmp.lt.s32.totalorder %s1231_s13, 3 }
  0x4d   : > { %217 = vst [vmem:[#allocation2 + $0x20] sm:$0xf] %v1322_v7 }
  0x4e   : > { %s1694_s13 = smov (!%p178_p5, %s1231_s13), 3 }
  0x4f   : > { %224 = vrot.lane.b32.xlu0 %v1316_v5, %s1187_s19  ;;  %250 = vrot.lane.b32.xlu1 %v1312_v3, %s1188_s20  ;;  %s1020_s7 = sshll.u32 %s1694_s13, 3 }
  0x50   : > { %s181_s10 = scalar_lea.vmem %s1682_s2, %s1020_s7 }
  0x53   : > { %252 = vrot.lane.b32.xlu0 %v1316_v5, %s1188_s20  ;;  %278 = vrot.lane.b32.xlu1 %v1312_v3, %s1189_s21 }
  0x57   : > { %280 = vrot.lane.b32.xlu0 %v1316_v5, %s1189_s21  ;;  %248 = vrot.lane.b32.xlu1 %v1314_v4, %s1188_s20 }
  0x5b   : > { %276 = vrot.lane.b32.xlu0 %v1314_v4, %s1189_s21  ;;  %306 = vrot.lane.b32.xlu1 %v1312_v3, %s1190_s22 }
  0x5f   : > { %308 = vrot.lane.b32.xlu0 %v1316_v5, %s1190_s22  ;;  %334 = vrot.lane.b32.xlu1 %v1312_v3, %s1191_s23 }
  0x63   : > { %336 = vrot.lane.b32.xlu0 %v1316_v5, %s1191_s23  ;;  %304 = vrot.lane.b32.xlu1 %v1314_v4, %s1190_s22 }
  0x67   : > { %332 = vrot.lane.b32.xlu0 %v1314_v4, %s1191_s23  ;;  %362 = vrot.lane.b32.xlu1 %v1312_v3, %s1192_s24 }
  0x6b   : > { %364 = vrot.lane.b32.xlu0 %v1316_v5, %s1192_s24  ;;  %390 = vrot.lane.b32.xlu1 %v1312_v3, %s1193_s25 }
  0x6f   : > { %392 = vrot.lane.b32.xlu0 %v1316_v5, %s1193_s25  ;;  %360 = vrot.lane.b32.xlu1 %v1314_v4, %s1192_s24 }
  0x73   : > { %388 = vrot.lane.b32.xlu0 %v1314_v4, %s1193_s25  ;;  %418 = vrot.lane.b32.xlu1 %v1312_v3, %s1194_s26 }
  0x77   : > { %420 = vrot.lane.b32.xlu0 %v1316_v5, %s1194_s26  ;;  %446 = vrot.lane.b32.xlu1 %v1312_v3, %s1195_s27 }
  0x7b   : > { %448 = vrot.lane.b32.xlu0 %v1316_v5, %s1195_s27  ;;  %416 = vrot.lane.b32.xlu1 %v1314_v4, %s1194_s26 }
  0x7f   : > { %444 = vrot.lane.b32.xlu0 %v1314_v4, %s1195_s27  ;;  %474 = vrot.lane.b32.xlu1 %v1312_v3, %s1196_s28 }
  0x83   : > { %476 = vrot.lane.b32.xlu0 %v1316_v5, %s1196_s28  ;;  %502 = vrot.lane.b32.xlu1 %v1312_v3, %s1197_s29 }
  0x87   : > { %504 = vrot.lane.b32.xlu0 %v1316_v5, %s1197_s29  ;;  %472 = vrot.lane.b32.xlu1 %v1314_v4, %s1196_s28 }
  0x8b   : > { %500 = vrot.lane.b32.xlu0 %v1314_v4, %s1197_s29  ;;  %530 = vrot.lane.b32.xlu1 %v1312_v3, %s1198_s30 }
  0x8f   : > { %532 = vrot.lane.b32.xlu0 %v1316_v5, %s1198_s30  ;;  %558 = vrot.lane.b32.xlu1 %v1312_v3, %s1199_s4 }
  0x93   : > { %560 = vrot.lane.b32.xlu0 %v1316_v5, %s1199_s4  ;;  %528 = vrot.lane.b32.xlu1 %v1314_v4, %s1198_s30 }
  0x97   : > { %556 = vrot.lane.b32.xlu0 %v1314_v4, %s1199_s4  ;;  %226 = vrot.lane.b32.xlu1 %v1318_v6, %s1187_s19 }
  0x9b   : > { %228 = vrot.lane.b32.xlu0 %v1322_v7, %s1187_s19  ;;  %586 = vrot.lane.b32.xlu1 %v1312_v3, %s1200_s5 }
  0x9f   : > { %588 = vrot.lane.b32.xlu0 %v1316_v5, %s1200_s5  ;;  %614 = vrot.lane.b32.xlu1 %v1312_v3, %s1201_s6 }
  0xa3   : > { %616 = vrot.lane.b32.xlu0 %v1316_v5, %s1201_s6  ;;  %584 = vrot.lane.b32.xlu1 %v1314_v4, %s1200_s5 }
  0xa7   : > { %612 = vrot.lane.b32.xlu0 %v1314_v4, %s1201_s6  ;;  %254 = vrot.lane.b32.xlu1 %v1318_v6, %s1188_s20 }
  0xab   : > { %256 = vrot.lane.b32.xlu0 %v1322_v7, %s1188_s20  ;;  %282 = vrot.lane.b32.xlu1 %v1318_v6, %s1189_s21 }
  0xaf   : > { %284 = vrot.lane.b32.xlu0 %v1322_v7, %s1189_s21  ;;  %230 = vrot.lane.b32.xlu1 %v1431_v8, %s1187_s19 }
  0xb3   : > { %310 = vrot.lane.b32.xlu0 %v1318_v6, %s1190_s22  ;;  %312 = vrot.lane.b32.xlu1 %v1322_v7, %s1190_s22 }
  0xb7   : > { %338 = vrot.lane.b32.xlu0 %v1318_v6, %s1191_s23  ;;  %340 = vrot.lane.b32.xlu1 %v1322_v7, %s1191_s23 }
  0xbb   : > { %258 = vrot.lane.b32.xlu0 %v1431_v8, %s1188_s20  ;;  %286 = vrot.lane.b32.xlu1 %v1431_v8, %s1189_s21 }
  0xbd   : > { %v223_v10 = vpop.permute.xlu0 %222  ;;  %v221_v11 = vpop.permute.xlu1 %220 }
  0xbe   : > { %v233_v12 = vsel %vm232_vm0, %v221_v11, %v223_v10 }
  0xbf   : > { %243 = vst [vmem:[#allocation2] sm:$0xf0] %v233_v12  ;;  %366 = vrot.lane.b32.xlu0 %v1318_v6, %s1192_s24  ;;  %368 = vrot.lane.b32.xlu1 %v1322_v7, %s1192_s24 }
  0xc1   : > { %v1454_v13 = vpop.permute.xlu0 %224  ;;  %v251_v14 = vpop.permute.xlu1 %250 }
  0xc2   : > { %v234_v15 = vsel %vm232_vm0, %v223_v10, %v1454_v13 }
  0xc3   : > { %244 = vst [vmem:[#allocation2 + $0x8] sm:$0xf0] %v234_v15  ;;  %394 = vrot.lane.b32.xlu0 %v1318_v6, %s1193_s25  ;;  %396 = vrot.lane.b32.xlu1 %v1322_v7, %s1193_s25 }
  0xc5   : > { %v1462_v16 = vpop.permute.xlu0 %252  ;;  %v279_v17 = vpop.permute.xlu1 %278 }
  0xc6   : > { %v262_v18 = vsel %vm260_vm1, %v251_v14, %v1462_v16  ;;  %v641_v24 = vld [vmem:[#allocation2] sm:$0xff] }
  0xc7   : > { %272 = vst [vmem:[#allocation2 + $0x30] sm:$0xf] %v262_v18  ;;  %314 = vrot.lane.b32.xlu0 %v1431_v8, %s1190_s22  ;;  %342 = vrot.lane.b32.xlu1 %v1431_v8, %s1191_s23 }
  0xc9   : > { %v1470_v19 = vpop.permute.xlu0 %280  ;;  %v249_v20 = vpop.permute.xlu1 %248 }
  0xca   : > { %v290_v21 = vsel %vm288_vm2, %v279_v17, %v1470_v19  ;;  %v261_v22 = vsel %vm260_vm1, %v249_v20, %v251_v14  ;;  %v642_v23 = vld [vmem:[#allocation2 + $0x8] sm:$0xff] }
  0xcb   : > { %300 = vst [vmem:[#allocation2 + $0x30] sm:$0xf0] %v290_v21  ;;  %271 = vst [vmem:[#allocation2 + $0x28] sm:$0xf] %v261_v22  ;;  %681 = vmatprep.subr.bf16.mxu0 %v642_v23  ;;  %422 = vrot.lane.b32.xlu0 %v1318_v6, %s1194_s26 }
  0xcc   : > { %424 = vrot.lane.b32.xlu1 %v1322_v7, %s1194_s26  ;;  %682 = vmatpush1.bf16.msra.mxu0 %v641_v24 }
  0xcd   : > { %v277_v25 = vpop.permute.xlu0 %276  ;;  %v307_v26 = vpop.permute.xlu1 %306 }
  0xce   : > { %v289_v27 = vsel %vm288_vm2, %v277_v25, %v279_v17 }
  0xcf   : > { %299 = vst [vmem:[#allocation2 + $0x28] sm:$0xf0] %v289_v27  ;;  %450 = vrot.lane.b32.xlu0 %v1318_v6, %s1195_s27 }
  0xd0   : > { %452 = vrot.lane.b32.xlu1 %v1322_v7, %s1195_s27 }
  0xd1   : > { %v1484_v28 = vpop.permute.xlu0 %308  ;;  %v335_v29 = vpop.permute.xlu1 %334 }
  0xd2   : > { %v318_v30 = vsel %vm316_vm3, %v307_v26, %v1484_v28  ;;  %v647_v31 = vld [vmem:[#allocation2 + $0x30] sm:$0xff] }
  0xd3   : > { %328 = vst [vmem:[#allocation2 + $0x58] sm:$0xf] %v318_v30  ;;  %370 = vrot.lane.b32.xlu0 %v1431_v8, %s1192_s24  ;;  %683 = vmatprep.subr.bf16.mxu0 %v647_v31 }
  0xd4   : > { %398 = vrot.lane.b32.xlu1 %v1431_v8, %s1193_s25 }
  0xd5   : > { %v1492_v32 = vpop.permute.xlu0 %336  ;;  %v305_v33 = vpop.permute.xlu1 %304 }
  0xd6   : > { %v346_v34 = vsel %vm344_vm4, %v335_v29, %v1492_v32  ;;  %v317_v35 = vsel %vm316_vm3, %v305_v33, %v307_v26  ;;  %v646_v36 = vld [vmem:[#allocation2 + $0x28] sm:$0xff] }
  0xd7   : > { %356 = vst [vmem:[#allocation2 + $0x58] sm:$0xf0] %v346_v34  ;;  %327 = vst [vmem:[#allocation2 + $0x50] sm:$0xf] %v317_v35  ;;  %478 = vrot.lane.b32.xlu0 %v1318_v6, %s1196_s28  ;;  %684 = vmatpush1.bf16.msra.mxu0 %v646_v36 }
  0xd8   : > { %480 = vrot.lane.b32.xlu1 %v1322_v7, %s1196_s28 }
  0xd9   : > { %v333_v37 = vpop.permute.xlu0 %332  ;;  %v363_v38 = vpop.permute.xlu1 %362 }
  0xda   : > { %v345_v39 = vsel %vm344_vm4, %v333_v37, %v335_v29 }
  0xdb   : > { %355 = vst [vmem:[#allocation2 + $0x50] sm:$0xf0] %v345_v39  ;;  %506 = vrot.lane.b32.xlu0 %v1318_v6, %s1197_s29 }
  0xdc   : > { %508 = vrot.lane.b32.xlu1 %v1322_v7, %s1197_s29 }
  0xdd   : > { %v1506_v40 = vpop.permute.xlu0 %364  ;;  %v391_v41 = vpop.permute.xlu1 %390 }
  0xde   : > { %v374_v42 = vsel %vm372_vm5, %v363_v38, %v1506_v40  ;;  %v652_v43 = vld [vmem:[#allocation2 + $0x58] sm:$0xff] }
  0xdf   : > { %384 = vst [vmem:[#allocation2 + $0x80] sm:$0xf] %v374_v42  ;;  %426 = vrot.lane.b32.xlu0 %v1431_v8, %s1194_s26  ;;  %685 = vmatprep.subr.bf16.mxu0 %v652_v43 }
  0xe0   : > { %454 = vrot.lane.b32.xlu1 %v1431_v8, %s1195_s27 }
  0xe1   : > { %v1514_v44 = vpop.permute.xlu0 %392  ;;  %v361_v45 = vpop.permute.xlu1 %360 }
  0xe2   : > { %v402_v46 = vsel %vm400_vm6, %v391_v41, %v1514_v44  ;;  %v373_v47 = vsel %vm372_vm5, %v361_v45, %v363_v38  ;;  %v651_v48 = vld [vmem:[#allocation2 + $0x50] sm:$0xff] }
  0xe3   : > { %412 = vst [vmem:[#allocation2 + $0x80] sm:$0xf0] %v402_v46  ;;  %383 = vst [vmem:[#allocation2 + $0x78] sm:$0xf] %v373_v47  ;;  %534 = vrot.lane.b32.xlu0 %v1318_v6, %s1198_s30  ;;  %686 = vmatpush1.bf16.msra.mxu0 %v651_v48 }
  0xe4   : > { %536 = vrot.lane.b32.xlu1 %v1322_v7, %s1198_s30 }
  0xe5   : > { %v389_v49 = vpop.permute.xlu0 %388  ;;  %v419_v50 = vpop.permute.xlu1 %418 }
  0xe6   : > { %v401_v51 = vsel %vm400_vm6, %v389_v49, %v391_v41 }
  0xe7   : > { %411 = vst [vmem:[#allocation2 + $0x78] sm:$0xf0] %v401_v51  ;;  %562 = vrot.lane.b32.xlu0 %v1318_v6, %s1199_s4 }
  0xe8   : > { %564 = vrot.lane.b32.xlu1 %v1322_v7, %s1199_s4 }
  0xe9   : > { %v1528_v52 = vpop.permute.xlu0 %420  ;;  %v447_v53 = vpop.permute.xlu1 %446 }
  0xea   : > { %v430_v54 = vsel %vm428_vm7, %v419_v50, %v1528_v52  ;;  %v657_v55 = vld [vmem:[#allocation2 + $0x80] sm:$0xff] }
  0xeb   : > { %440 = vst [vmem:[#allocation2 + $0xa8] sm:$0xf] %v430_v54  ;;  %482 = vrot.lane.b32.xlu0 %v1431_v8, %s1196_s28  ;;  %687 = vmatprep.subr.bf16.mxu0 %v657_v55 }
  0xec   : > { %510 = vrot.lane.b32.xlu1 %v1431_v8, %s1197_s29 }
  0xed   : > { %v1536_v56 = vpop.permute.xlu0 %448  ;;  %v417_v57 = vpop.permute.xlu1 %416 }
  0xee   : > { %v458_v58 = vsel %vm456_vm8, %v447_v53, %v1536_v56  ;;  %v429_v59 = vsel %vm428_vm7, %v417_v57, %v419_v50  ;;  %v656_v60 = vld [vmem:[#allocation2 + $0x78] sm:$0xff] }
  0xef   : > { %468 = vst [vmem:[#allocation2 + $0xa8] sm:$0xf0] %v458_v58  ;;  %439 = vst [vmem:[#allocation2 + $0xa0] sm:$0xf] %v429_v59  ;;  %590 = vrot.lane.b32.xlu0 %v1318_v6, %s1200_s5  ;;  %688 = vmatpush1.bf16.msra.mxu0 %v656_v60  ;;  %v1598_v60 = vld [vmem:[#allocation5] sm:$0xf] }
  0xf0   : > { %592 = vrot.lane.b32.xlu1 %v1322_v7, %s1200_s5 }
  0xf1   : > { %v445_v61 = vpop.permute.xlu0 %444  ;;  %v475_v62 = vpop.permute.xlu1 %474 }
  0xf2   : > { %v457_v63 = vsel %vm456_vm8, %v445_v61, %v447_v53  ;;  %v1203_v61 = vmov 0.0  }
  0xf3   : > { %467 = vst [vmem:[#allocation2 + $0xa0] sm:$0xf0] %v457_v63  ;;  %618 = vrot.lane.b32.xlu0 %v1318_v6, %s1201_s6 }
  0xf4   : > { %620 = vrot.lane.b32.xlu1 %v1322_v7, %s1201_s6 }
  0xf5   : > { %v1550_v0 = vpop.permute.xlu0 %476  ;;  %v503_v1 = vpop.permute.xlu1 %502 }
  0xf6   : > { %v486_v2 = vsel %vm484_vm9, %v475_v62, %v1550_v0  ;;  %v662_v3 = vld [vmem:[#allocation2 + $0xa8] sm:$0xff] }
  0xf7   : > { %496 = vst [vmem:[#allocation2 + $0xd0] sm:$0xf] %v486_v2  ;;  %538 = vrot.lane.b32.xlu0 %v1431_v8, %s1198_s30  ;;  %689 = vmatprep.subr.bf16.mxu0 %v662_v3 }
  0xf8   : > { %566 = vrot.lane.b32.xlu1 %v1431_v8, %s1199_s4 }
  0xf9   : > { %v1558_v4 = vpop.permute.xlu0 %504  ;;  %v473_v5 = vpop.permute.xlu1 %472 }
  0xfa   : > { %v514_v6 = vsel %vm512_vm10, %v503_v1, %v1558_v4  ;;  %v485_v7 = vsel %vm484_vm9, %v473_v5, %v475_v62  ;;  %v661_v9 = vld [vmem:[#allocation2 + $0xa0] sm:$0xff] }
  0xfb   : > { %524 = vst [vmem:[#allocation2 + $0xd0] sm:$0xf0] %v514_v6  ;;  %495 = vst [vmem:[#allocation2 + $0xc8] sm:$0xf] %v485_v7  ;;  %594 = vrot.lane.b32.xlu0 %v1431_v8, %s1200_s5  ;;  %690 = vmatpush1.bf16.msra.mxu0 %v661_v9 }
  0xfc   : > { %622 = vrot.lane.b32.xlu1 %v1431_v8, %s1201_s6 }
  0xfd   : > { %v501_v10 = vpop.permute.xlu0 %500  ;;  %v531_v11 = vpop.permute.xlu1 %530 }
  0xfe   : > { %v513_v12 = vsel %vm512_vm10, %v501_v10, %v503_v1 }
  0xff   : > { %523 = vst [vmem:[#allocation2 + $0xc8] sm:$0xf0] %v513_v12 }
 0x101   : > { %v1568_v14 = vpop.permute.xlu0 %532  ;;  %v559_v15 = vpop.permute.xlu1 %558 }
 0x102   : > { %v542_v17 = vsel %vm540_vm11, %v531_v11, %v1568_v14  ;;  %v667_v18 = vld [vmem:[#allocation2 + $0xd0] sm:$0xff] }
 0x103   : > { %552 = vst [vmem:[#allocation2 + $0xf8] sm:$0xf] %v542_v17  ;;  %691 = vmatprep.subr.bf16.mxu0 %v667_v18 }
 0x105   : > { %v1572_v20 = vpop.permute.xlu0 %560  ;;  %v529_v21 = vpop.permute.xlu1 %528 }
 0x106   : > { %v570_v8 = vsel %vm568_vm12, %v559_v15, %v1572_v20  ;;  %v541_v22 = vsel %vm540_vm11, %v529_v21, %v531_v11  ;;  %v666_v23 = vld [vmem:[#allocation2 + $0xc8] sm:$0xff] }
 0x107   : > { %580 = vst [vmem:[#allocation2 + $0xf8] sm:$0xf0] %v570_v8  ;;  %551 = vst [vmem:[#allocation2 + $0xf0] sm:$0xf] %v541_v22  ;;  %692 = vmatpush1.bf16.msra.mxu0 %v666_v23 }
 0x109   : > { %v557_v24 = vpop.permute.xlu0 %556  ;;  %v227_v25 = vpop.permute.xlu1 %226 }
 0x10a   : > { %v569_v26 = vsel %vm568_vm12, %v557_v24, %v559_v15  ;;  %v235_v27 = vsel %vm232_vm0, %v1454_v13, %v227_v25 }
 0x10b   : > { %579 = vst [vmem:[#allocation2 + $0xf0] sm:$0xf0] %v569_v26  ;;  %245 = vst [vmem:[#allocation2 + $0x10] sm:$0xf0] %v235_v27 }
 0x10d   : > { %v229_v29 = vpop.permute.xlu0 %228  ;;  %v587_v30 = vpop.permute.xlu1 %586 }
 0x10e   : > { %v236_v31 = vsel %vm232_vm0, %v227_v25, %v229_v29  ;;  %v672_v33 = vld [vmem:[#allocation2 + $0xf8] sm:$0xff] }
 0x10f   : > { %246 = vst [vmem:[#allocation2 + $0x18] sm:$0xf0] %v236_v31  ;;  %693 = vmatprep.subr.bf16.mxu0 %v672_v33 }
 0x111   : > { %v1581_v34 = vpop.permute.xlu0 %588  ;;  %v615_v35 = vpop.permute.xlu1 %614 }
 0x112   : > { %v598_v36 = vsel %vm596_vm13, %v587_v30, %v1581_v34  ;;  %v671_v37 = vld [vmem:[#allocation2 + $0xf0] sm:$0xff] }
 0x113   : > { %608 = vst [vmem:[#allocation2 + $0x120] sm:$0xf] %v598_v36  ;;  %694 = vmatpush1.bf16.msra.mxu0 %v671_v37  ;;  %v643_v43 = vld [vmem:[#allocation2 + $0x10] sm:$0xff] }
 0x115   : > { %v1585_v13 = vpop.permute.xlu0 %616  ;;  %v585_v38 = vpop.permute.xlu1 %584 }
 0x116   : > { %v626_v39 = vsel %vm624_vm14, %v615_v35, %v1585_v13  ;;  %v597_v41 = vsel %vm596_vm13, %v585_v38, %v587_v30  ;;  %v644_v42 = vld [vmem:[#allocation2 + $0x18] sm:$0xff] }
 0x117   : > { %636 = vst [vmem:[#allocation2 + $0x120] sm:$0xf0] %v626_v39  ;;  %607 = vst [vmem:[#allocation2 + $0x118] sm:$0xf] %v597_v41  ;;  %722 = vmatprep.subr.bf16.mxu1 %v644_v42 }
 0x118   : > { %723 = vmatpush1.bf16.msra.mxu1 %v643_v43 }
 0x119   : > { %v613_v45 = vpop.permute.xlu0 %612  ;;  %v255_v46 = vpop.permute.xlu1 %254 }
 0x11a   : > { %v625_v47 = vsel %vm624_vm14, %v613_v45, %v615_v35  ;;  %v263_v48 = vsel %vm260_vm1, %v1462_v16, %v255_v46 }
 0x11b   : > { %635 = vst [vmem:[#allocation2 + $0x118] sm:$0xf0] %v625_v47  ;;  %273 = vst [vmem:[#allocation2 + $0x38] sm:$0xf] %v263_v48 }
 0x11d   : > { %v257_v49 = vpop.permute.xlu0 %256  ;;  %v283_v50 = vpop.permute.xlu1 %282 }
 0x11e   : > { %v264_v51 = vsel %vm260_vm1, %v255_v46, %v257_v49  ;;  %v291_v53 = vsel %vm288_vm2, %v1470_v19, %v283_v50  ;;  %v677_v54 = vld [vmem:[#allocation2 + $0x120] sm:$0xff] }
 0x11f   : > { %274 = vst [vmem:[#allocation2 + $0x40] sm:$0xf] %v264_v51  ;;  %301 = vst [vmem:[#allocation2 + $0x38] sm:$0xf0] %v291_v53  ;;  %695 = vmatprep.subr.bf16.mxu0 %v677_v54 }
 0x121   : > { %v285_v55 = vpop.permute.xlu0 %284  ;;  %v231_v57 = vpop.permute.xlu1 %230 }
 0x122   : > { %v292_v58 = vsel %vm288_vm2, %v283_v50, %v285_v55  ;;  %v237_v59 = vsel %vm232_vm0, %v229_v29, %v231_v57  ;;  %v676_v16 = vld [vmem:[#allocation2 + $0x118] sm:$0xff] }
 0x123   : > { %302 = vst [vmem:[#allocation2 + $0x40] sm:$0xf0] %v292_v58  ;;  %247 = vst [vmem:[#allocation2 + $0x20] sm:$0xf0] %v237_v59  ;;  %696 = vmatpush1.bf16.msra.mxu0 %v676_v16 }
 0x124   : > { %1040 = vmatprep.subr.bf16.mxu0 %v1203_v61 }
 0x125   : > { %v311_v19 = vpop.permute.xlu0 %310  ;;  %v313_v62 = vpop.permute.xlu1 %312 }
 0x126   : > { %v319_v63 = vsel %vm316_vm3, %v1484_v28, %v311_v19  ;;  %v320_v1 = vsel %vm316_vm3, %v311_v19, %v313_v62  ;;  %714 = vmatmul.mubr.bf16.vlgmr.msra.gmra.mrb[0].mxu0 %v1598_v60  ;;  %v648_v28 = vld [vmem:[#allocation2 + $0x38] sm:$0xff] }
 0x127   : > { %329 = vst [vmem:[#allocation2 + $0x60] sm:$0xf] %v319_v63  ;;  %330 = vst [vmem:[#allocation2 + $0x68] sm:$0xf] %v320_v1  ;;  %1056 = vmatprep.mubr.msk.bf16.mxu0 %vm1204_vm15, %v1203_v61 }
 0x129   : > { %v339_v2 = vpop.permute.xlu0 %338  ;;  %v341_v3 = vpop.permute.xlu1 %340 }
 0x12a   : > { %v347_v5 = vsel %vm344_vm4, %v1492_v32, %v339_v2  ;;  %v348_v6 = vsel %vm344_vm4, %v339_v2, %v341_v3  ;;  %v649_v7 = vld [vmem:[#allocation2 + $0x40] sm:$0xff] }
 0x12b   : > { %v645_v9 = vld [vmem:[#allocation2 + $0x20] sm:$0xff]  ;;  %357 = vst [vmem:[#allocation2 + $0x60] sm:$0xf0] %v347_v5  ;;  %358 = vst [vmem:[#allocation2 + $0x68] sm:$0xf0] %v348_v6  ;;  %724 = vmatprep.subr.bf16.mxu1 %v649_v7 }
 0x12c   : > { %1041 = vmatpush3.bf16.msra.mxu0 %v645_v9  ;;  %725 = vmatpush1.bf16.msra.mxu1 %v648_v28 }
 0x12d   : > { %1042 = vmatprep.subr.bf16.mxu0 %v1203_v61  ;;  %v259_v10 = vpop.permute.xlu0 %258  ;;  %v287_v11 = vpop.permute.xlu1 %286 }
 0x12e   : > { %v265_v12 = vsel %vm260_vm1, %v257_v49, %v259_v10  ;;  %v293_v15 = vsel %vm288_vm2, %v285_v55, %v287_v11 }
 0x12f   : > { %275 = vst [vmem:[#allocation2 + $0x48] sm:$0xf] %v265_v12  ;;  %303 = vst [vmem:[#allocation2 + $0x48] sm:$0xf0] %v293_v15 }
 0x131   : > { %v367_v32 = vpop.permute.xlu0 %366  ;;  %v369_v17 = vpop.permute.xlu1 %368 }
 0x132   : > { %v375_v18 = vsel %vm372_vm5, %v1506_v40, %v367_v32  ;;  %v376_v21 = vsel %vm372_vm5, %v367_v32, %v369_v17  ;;  %v654_v8 = vld [vmem:[#allocation2 + $0x68] sm:$0xff]  ;;  %v653_v22 = vld [vmem:[#allocation2 + $0x60] sm:$0xff] }
 0x133   : > { %385 = vst [vmem:[#allocation2 + $0x88] sm:$0xf] %v375_v18  ;;  %386 = vst [vmem:[#allocation2 + $0x90] sm:$0xf] %v376_v21  ;;  %726 = vmatprep.subr.bf16.mxu1 %v654_v8 }
 0x134   : > { %727 = vmatpush1.bf16.msra.mxu1 %v653_v22 }
 0x135   : > { %v395_v23 = vpop.permute.xlu0 %394  ;;  %v397_v24 = vpop.permute.xlu1 %396 }
 0x136   : > { %v403_v25 = vsel %vm400_vm6, %v1514_v44, %v395_v23  ;;  %v404_v26 = vsel %vm400_vm6, %v395_v23, %v397_v24  ;;  %v650_v27 = vld [vmem:[#allocation2 + $0x48] sm:$0xff] }
 0x137   : > { %413 = vst [vmem:[#allocation2 + $0x88] sm:$0xf0] %v403_v25  ;;  %414 = vst [vmem:[#allocation2 + $0x90] sm:$0xf0] %v404_v26  ;;  %1043 = vmatpush3.bf16.msra.mxu0 %v650_v27 }
 0x138   : > { %1044 = vmatprep.subr.bf16.mxu0 %v1203_v61 }
 0x139   : > { %v315_v40 = vpop.permute.xlu0 %314  ;;  %v343_v29 = vpop.permute.xlu1 %342 }
 0x13a   : > { %v321_v30 = vsel %vm316_vm3, %v313_v62, %v315_v40  ;;  %v349_v31 = vsel %vm344_vm4, %v341_v3, %v343_v29 }
 0x13b   : > { %331 = vst [vmem:[#allocation2 + $0x70] sm:$0xf] %v321_v30  ;;  %359 = vst [vmem:[#allocation2 + $0x70] sm:$0xf0] %v349_v31 }
 0x13d   : > { %v423_v33 = vpop.permute.xlu0 %422 }
 0x13e   : > { %v431_v44 = vsel %vm428_vm7, %v1528_v52, %v423_v33  ;;  %v425_v35 = vpop.permute.xlu1 %424  ;;  %v659_v36 = vld [vmem:[#allocation2 + $0x90] sm:$0xff]  ;;  %v658_v37 = vld [vmem:[#allocation2 + $0x88] sm:$0xff] }
 0x13f   : > { %441 = vst [vmem:[#allocation2 + $0xb0] sm:$0xf] %v431_v44  ;;  %v432_v38 = vsel %vm428_vm7, %v423_v33, %v425_v35  ;;  %728 = vmatprep.subr.bf16.mxu1 %v659_v36 }
 0x140   : > { %442 = vst [vmem:[#allocation2 + $0xb8] sm:$0xf] %v432_v38  ;;  %729 = vmatpush1.bf16.msra.mxu1 %v658_v37 }
 0x141   : > { %v451_v39 = vpop.permute.xlu0 %450 }
 0x142   : > { %v459_v41 = vsel %vm456_vm8, %v1536_v56, %v451_v39  ;;  %v453_v42 = vpop.permute.xlu1 %452  ;;  %v655_v43 = vld [vmem:[#allocation2 + $0x70] sm:$0xff] }
 0x143   : > { %469 = vst [vmem:[#allocation2 + $0xb0] sm:$0xf0] %v459_v41  ;;  %v460_v45 = vsel %vm456_vm8, %v451_v39, %v453_v42  ;;  %1045 = vmatpush3.bf16.msra.mxu0 %v655_v43  ;;  %v803_v39 = vlaneseq }
 0x144   : > { %470 = vst [vmem:[#allocation2 + $0xb8] sm:$0xf0] %v460_v45  ;;  %1046 = vmatprep.subr.bf16.mxu0 %v1203_v61 }
 0x145   : > { %v371_v52 = vpop.permute.xlu0 %370  ;;  %v804_v41 = vand.u32 127, %v803_v39 }
 0x146   : > { %v377_v46 = vsel %vm372_vm5, %v369_v17, %v371_v52  ;;  %v399_v47 = vpop.permute.xlu1 %398 }
 0x147   : > { %387 = vst [vmem:[#allocation2 + $0x98] sm:$0xf] %v377_v46  ;;  %v405_v48 = vsel %vm400_vm6, %v397_v24, %v399_v47  ;;  %v805_v43 = vadd.s32 128, %v804_v41 }
 0x148   : > { %415 = vst [vmem:[#allocation2 + $0x98] sm:$0xf0] %v405_v48 }
 0x149   : > { %v479_v49 = vpop.permute.xlu0 %478 }
 0x14a   : > { %v487_v56 = vsel %vm484_vm9, %v1550_v0, %v479_v49  ;;  %v481_v50 = vpop.permute.xlu1 %480  ;;  %v663_v51 = vld [vmem:[#allocation2 + $0xb0] sm:$0xff] }
 0x14b   : > { %497 = vst [vmem:[#allocation2 + $0xd8] sm:$0xf] %v487_v56  ;;  %v488_v53 = vsel %vm484_vm9, %v479_v49, %v481_v50  ;;  %v664_v54 = vld [vmem:[#allocation2 + $0xb8] sm:$0xff] }
 0x14c   : > { %498 = vst [vmem:[#allocation2 + $0xe0] sm:$0xf] %v488_v53  ;;  %730 = vmatprep.subr.bf16.mxu1 %v664_v54 }
 0x14d   : > { %731 = vmatpush1.bf16.msra.mxu1 %v663_v51  ;;  %v507_v55 = vpop.permute.xlu0 %506 }
 0x14e   : > { %v515_v57 = vsel %vm512_vm10, %v1558_v4, %v507_v55  ;;  %v509_v58 = vpop.permute.xlu1 %508 }
 0x14f   : > { %525 = vst [vmem:[#allocation2 + $0xd8] sm:$0xf0] %v515_v57  ;;  %v516_v59 = vsel %vm512_vm10, %v507_v55, %v509_v58  ;;  %v660_v16 = vld [vmem:[#allocation2 + $0x98] sm:$0xff] }
 0x150   : > { %526 = vst [vmem:[#allocation2 + $0xe0] sm:$0xf0] %v516_v59  ;;  %1047 = vmatpush3.bf16.msra.mxu0 %v660_v16 }
 0x151   : > { %v427_v0 = vpop.permute.xlu0 %426  ;;  %1048 = vmatprep.subr.bf16.mxu0 %v1203_v61 }
 0x152   : > { %v433_v19 = vsel %vm428_vm7, %v425_v35, %v427_v0  ;;  %v455_v62 = vpop.permute.xlu1 %454 }
 0x153   : > { %443 = vst [vmem:[#allocation2 + $0xc0] sm:$0xf] %v433_v19  ;;  %v461_v63 = vsel %vm456_vm8, %v453_v42, %v455_v62  ;;  %v809_v42 = vstv %s187_s16  ;;  %s185_s16 = scalar_lea.vmem %s1683_s3, %s1020_s7 }
 0x154   : > { %471 = vst [vmem:[#allocation2 + $0xc0] sm:$0xf0] %v461_v63  ;;  %v810_v45 = vadd.s32 %v809_v42, %v804_v41  ;;  %v811_v52 = vadd.s32 %v809_v42, %v805_v43 }
 0x155   : > { %v535_v1 = vpop.permute.xlu0 %534 }
 0x156   : > { %v543_v4 = vsel %vm540_vm11, %v1568_v14, %v535_v1  ;;  %v537_v2 = vpop.permute.xlu1 %536  ;;  %v668_v3 = vld [vmem:[#allocation2 + $0xd8] sm:$0xff]  ;;  %v815_v46 = vcvt.s32.f32 %v810_v45  ;;  %v816_v47 = vcvt.s32.f32 %v811_v52 }
 0x157   : > { %553 = vst [vmem:[#allocation2 + $0x100] sm:$0xf] %v543_v4  ;;  %v544_v5 = vsel %vm540_vm11, %v535_v1, %v537_v2  ;;  %v669_v6 = vld [vmem:[#allocation2 + $0xe0] sm:$0xff] }
 0x158   : > { %554 = vst [vmem:[#allocation2 + $0x108] sm:$0xf] %v544_v5  ;;  %732 = vmatprep.subr.bf16.mxu1 %v669_v6  ;;  %v821_v48 = vmul.f32 0.028571429, %v815_v46  ;;  %v822_v49 = vmul.f32 0.028571429, %v816_v47 }
 0x159   : > { %733 = vmatpush1.bf16.msra.mxu1 %v668_v3  ;;  %v563_v7 = vpop.permute.xlu0 %562  ;;  %vm861_vm0 = vcmp.lt.f32.partialorder %v815_v46, 2450.0  ;;  %vm862_vm2 = vcmp.lt.f32.partialorder %v816_v47, 2450.0 }
 0x15a   : > { %v571_v9 = vsel %vm568_vm12, %v1572_v20, %v563_v7  ;;  %v565_v28 = vpop.permute.xlu1 %564  ;;  %v826_v56 = vfloor.f32 %v821_v48 }
 0x15b   : > { %581 = vst [vmem:[#allocation2 + $0x100] sm:$0xf0] %v571_v9  ;;  %v572_v10 = vsel %vm568_vm12, %v563_v7, %v565_v28  ;;  %v665_v11 = vld [vmem:[#allocation2 + $0xc0] sm:$0xff] }
 0x15c   : > { %582 = vst [vmem:[#allocation2 + $0x108] sm:$0xf0] %v572_v10  ;;  %1049 = vmatpush3.bf16.msra.mxu0 %v665_v11  ;;  %v841_v51 = vmul.f32 0.028571429, %v826_v56  ;;  %v831_v55 = vmul.f32 35.0, %v826_v56 }
 0x15d   : > { %v483_v14 = vpop.permute.xlu0 %482  ;;  %1050 = vmatprep.subr.bf16.mxu0 %v1203_v61 }
 0x15e   : > { %v489_v12 = vsel %vm484_vm9, %v481_v50, %v483_v14  ;;  %v511_v15 = vpop.permute.xlu1 %510  ;;  %v827_v50 = vfloor.f32 %v822_v49  ;;  %v846_v54 = vfloor.f32 %v841_v51  ;;  %v836_v59 = vsub.f32 %v815_v46, %v831_v55 }
 0x15f   : > { %499 = vst [vmem:[#allocation2 + $0xe8] sm:$0xf] %v489_v12  ;;  %v517_v32 = vsel %vm512_vm10, %v509_v58, %v511_v15  ;;  %v806_v14 = vadd.s32 256, %v804_v41  ;;  %v807_v12 = vadd.s32 384, %v804_v41 }
 0x160   : > { %527 = vst [vmem:[#allocation2 + $0xe8] sm:$0xf0] %v517_v32  ;;  %v842_v53 = vmul.f32 0.028571429, %v827_v50  ;;  %v832_v58 = vmul.f32 35.0, %v827_v50  ;;  %vm866_vm1 = vcmp.lt.f32.partialorder %v836_v59, 32.0 }
 0x161   : > { %v591_v17 = vpop.permute.xlu0 %590  ;;  %vm871_vm4 = vmand %vm861_vm0, %vm866_vm1  ;;  %v812_v15 = vadd.s32 %v809_v42, %v806_v14  ;;  %v813_v32 = vadd.s32 %v809_v42, %v807_v12 }
 0x162   : > { %v599_v20 = vsel %vm596_vm13, %v1581_v34, %v591_v17  ;;  %v593_v18 = vpop.permute.xlu1 %592  ;;  %v673_v21 = vld [vmem:[#allocation2 + $0x100] sm:$0xff]  ;;  %v847_v57 = vfloor.f32 %v842_v53  ;;  %v837_v0 = vsub.f32 %v816_v47, %v832_v58 }
 0x163   : > { %609 = vst [vmem:[#allocation2 + $0x128] sm:$0xf] %v599_v20  ;;  %v600_v8 = vsel %vm596_vm13, %v591_v17, %v593_v18  ;;  %v674_v22 = vld [vmem:[#allocation2 + $0x108] sm:$0xff]  ;;  %v808_v17 = vadd.s32 512, %v804_v41  ;;  %v817_v20 = vcvt.s32.f32 %v812_v15 }
 0x164   : > { %610 = vst [vmem:[#allocation2 + $0x130] sm:$0xf] %v600_v8  ;;  %734 = vmatprep.subr.bf16.mxu1 %v674_v22  ;;  %v852_v16 = vmul.f32 35.0, %v847_v57  ;;  %vm867_vm3 = vcmp.lt.f32.partialorder %v837_v0, 32.0 }
 0x165   : > { %735 = vmatpush1.bf16.msra.mxu1 %v673_v21  ;;  %v619_v23 = vpop.permute.xlu0 %618  ;;  %vm872_vm6 = vmand %vm862_vm2, %vm867_vm3  ;;  %v814_v21 = vadd.s32 %v809_v42, %v808_v17  ;;  %v823_v8 = vmul.f32 0.028571429, %v817_v20  ;;  %vm863_vm10 = vcmp.lt.f32.partialorder %v817_v20, 2450.0 }
 0x166   : > { %v627_v24 = vsel %vm624_vm14, %v1585_v13, %v619_v23  ;;  %v621_v25 = vpop.permute.xlu1 %620  ;;  %v857_v62 = vsub.f32 %v827_v50, %v852_v16 }
 0x167   : > { %637 = vst [vmem:[#allocation2 + $0x128] sm:$0xf0] %v627_v24  ;;  %v628_v26 = vsel %vm624_vm14, %v619_v23, %v621_v25  ;;  %v670_v27 = vld [vmem:[#allocation2 + $0xe8] sm:$0xff]  ;;  %v819_v23 = vcvt.s32.f32 %v814_v21  ;;  %v828_v24 = vfloor.f32 %v823_v8 }
 0x168   : > { %638 = vst [vmem:[#allocation2 + $0x130] sm:$0xf0] %v628_v26  ;;  %1051 = vmatpush3.bf16.msra.mxu0 %v670_v27  ;;  %vm877_vm7 = vcmp.lt.f32.partialorder %v857_v62, 32.0 }
 0x169   : > { %v539_v34 = vpop.permute.xlu0 %538  ;;  %1052 = vmatprep.subr.bf16.mxu0 %v1203_v61  ;;  %vm882_vm9 = vmand %vm872_vm6, %vm877_vm7  ;;  %v825_v26 = vmul.f32 0.028571429, %v819_v23  ;;  %v843_v27 = vmul.f32 0.028571429, %v828_v24 }
 0x16a   : > { %v545_v40 = vsel %vm540_vm11, %v537_v2, %v539_v34  ;;  %v567_v29 = vpop.permute.xlu1 %566  ;;  %v887_v1 = vsel %vm882_vm9, 1.0, %v1203_v61  ;;  %vm902_vm9 = vcmask 7168  }
 0x16b   : > { %555 = vst [vmem:[#allocation2 + $0x110] sm:$0xf] %v545_v40  ;;  %v573_v30 = vsel %vm568_vm12, %v565_v28, %v567_v29  ;;  %v830_v40 = vfloor.f32 %v825_v26  ;;  %v848_v29 = vfloor.f32 %v843_v27 }
 0x16c   : > { %583 = vst [vmem:[#allocation2 + $0x110] sm:$0xf0] %v573_v30  ;;  %v833_v30 = vmul.f32 35.0, %v828_v24 }
 0x16d   : > { %v595_v31 = vpop.permute.xlu0 %594  ;;  %v835_v41 = vmul.f32 35.0, %v830_v40 }
 0x16e   : > { %v601_v13 = vsel %vm596_vm13, %v593_v18, %v595_v31  ;;  %v623_v33 = vpop.permute.xlu1 %622  ;;  %v678_v44 = vld [vmem:[#allocation2 + $0x128] sm:$0xff]  ;;  %v818_v18 = vcvt.s32.f32 %v813_v32 }
 0x16f   : > { %611 = vst [vmem:[#allocation2 + $0x138] sm:$0xf] %v601_v13  ;;  %v629_v35 = vsel %vm624_vm14, %v621_v25, %v623_v33  ;;  %v679_v36 = vld [vmem:[#allocation2 + $0x130] sm:$0xff]  ;;  %v845_v33 = vmul.f32 0.028571429, %v830_v40  ;;  %v840_v45 = vsub.f32 %v819_v23, %v835_v41 }
 0x170   : > { %639 = vst [vmem:[#allocation2 + $0x138] sm:$0xf0] %v629_v35  ;;  %736 = vmatprep.subr.bf16.mxu1 %v679_v36  ;;  %v824_v22 = vmul.f32 0.028571429, %v818_v18  ;;  %v838_v35 = vsub.f32 %v817_v20, %v833_v30  ;;  %vm864_vm12 = vcmp.lt.f32.partialorder %v818_v18, 2450.0 }
 0x171   : > { %737 = vmatpush1.bf16.msra.mxu1 %v678_v44  ;;  %v853_v44 = vmul.f32 35.0, %v848_v29 }
 0x172   : > { %v829_v25 = vfloor.f32 %v824_v22  ;;  %vm868_vm11 = vcmp.lt.f32.partialorder %v838_v35, 32.0 }
 0x173   : > { %v675_v37 = vld [vmem:[#allocation2 + $0x110] sm:$0xff]  ;;  %v858_v39 = vsub.f32 %v828_v24, %v853_v44  ;;  %vm873_vm14 = vmand %vm863_vm10, %vm868_vm11 }
 0x174   : > { %755 = vmatmul.mubr.bf16.vlgmr.msra.gmra.mrb[0].mxu1 %v1598_v60  ;;  %1053 = vmatpush3.bf16.msra.mxu0 %v675_v37  ;;  %v844_v34 = vmul.f32 0.028571429, %v829_v25  ;;  %v834_v13 = vmul.f32 35.0, %v829_v25 }
 0x175   : > { %1054 = vmatprep.subr.bf16.mxu0 %v1203_v61  ;;  %vm878_vm15 = vcmp.lt.f32.partialorder %v858_v39, 32.0 }
 0x176   : > { %v849_v31 = vfloor.f32 %v844_v34  ;;  %v839_v37 = vsub.f32 %v818_v18, %v834_v13  ;;  %vm883_vm2 = vmand %vm873_vm14, %vm878_vm15 }
 0x177   : > { %v680_v38 = vld [vmem:[#allocation2 + $0x138] sm:$0xff]  ;;  %v888_v46 = vsel %vm883_vm2, 1.0, %v1203_v61 }
 0x178   : > { %1055 = vmatpush3.bf16.msra.mxu0 %v680_v38  ;;  %v854_v36 = vmul.f32 35.0, %v849_v31  ;;  %v850_v38 = vfloor.f32 %v845_v33  ;;  %vm869_vm13 = vcmp.lt.f32.partialorder %v839_v37, 32.0 }
 0x179   : > { %vm874_vm0 = vmand %vm864_vm12, %vm869_vm13 }
 0x17a   : > { %v859_v42 = vsub.f32 %v829_v25, %v854_v36  ;;  %v855_v43 = vmul.f32 35.0, %v850_v38 }
 0x17b   : > { %1057 = vmatmul.mubr.bf16.vlgmr.msra.gmra.mrb[4].mxu0 %v1598_v60  ;;  %v851_v60 = vmul.f32 35.0, %v846_v54 }
 0x17c   : > { %vm879_vm1 = vcmp.lt.f32.partialorder %v859_v42, 32.0  ;;  %v860_v52 = vsub.f32 %v830_v40, %v855_v43 }
 0x17d   : > { %v856_v19 = vsub.f32 %v826_v56, %v851_v60  ;;  %vm884_vm3 = vmand %vm874_vm0, %vm879_vm1 }
 0x17e   : > { %v889_v47 = vsel %vm884_vm3, 1.0, %v1203_v61  ;;  %vm880_vm7 = vcmp.lt.f32.partialorder %v860_v52, 32.0 }
 0x17f   : > { %vm876_vm5 = vcmp.lt.f32.partialorder %v856_v19, 32.0 }
 0x180   : > { %vm881_vm8 = vmand %vm871_vm4, %vm876_vm5  ;;  %vm865_vm4 = vcmp.lt.f32.partialorder %v819_v23, 2450.0  ;;  %vm870_vm5 = vcmp.lt.f32.partialorder %v840_v45, 32.0 }
 0x181   : > { %v886_v63 = vsel %vm881_vm8, 1.0, %v1203_v61  ;;  %vm875_vm6 = vmand %vm865_vm4, %vm870_vm5 }
 0x182   : > { %vm885_vm8 = vmand %vm875_vm6, %vm880_vm7 }
 0x183   : > { %v890_v60 = vsel %vm885_vm8, 1.0, %v1203_v61 }
 0x1f9   : > { %v715_v4 = vpop.f32.mrb[0].mxu0 }
 0x1fa   : > { %v891_v2 = vmul.f32 %v886_v63, %v715_v4  ;;  %v717_v3 = vpop.f32.mrb[1].mxu0 }
 0x1fb   : > { %v892_v5 = vmul.f32 %v887_v1, %v717_v3  ;;  %v719_v6 = vpop.f32.mrb[2].mxu0 }
 0x1fc   : > { %v904_v7 = vmul.f32 %v891_v2, %v715_v4  ;;  %v720_v9 = vpop.f32.mrb[3].mxu0 }
 0x1fd   : > { %v896_v28 = vadd.f32 %v892_v5, %v891_v2  ;;  %v905_v10 = vmul.f32 %v892_v5, %v717_v3 }
 0x1ff   : > { %v909_v11 = vadd.f32 %v905_v10, %v904_v7 }
 0x247   : > { %v756_v48 = vpop.f32.mrb[0].mxu1 }
 0x248   : > { %v893_v49 = vmul.f32 %v888_v46, %v756_v48  ;;  %v758_v56 = vpop.f32.mrb[1].mxu1 }
 0x249   : > { %v894_v50 = vmul.f32 %v889_v47, %v758_v56  ;;  %v760_v51 = vpop.f32.mrb[2].mxu1 }
 0x24a   : > { %v897_v53 = vadd.f32 %v896_v28, %v893_v49  ;;  %v906_v54 = vmul.f32 %v893_v49, %v756_v48  ;;  %v761_v55 = vpop.f32.mrb[3].mxu1 }
 0x24b   : > { %v907_v57 = vmul.f32 %v894_v50, %v758_v56 }
 0x24c   : > { %v910_v58 = vadd.f32 %v909_v11, %v906_v54  ;;  %v898_v59 = vadd.f32 %v897_v53, %v894_v50 }
 0x24e   : > { %v797_v16 = vpop.f32.mrb[4].mxu0  ;;  %v911_v0 = vadd.f32 %v910_v58, %v907_v57 }
 0x24f   : > { %v895_v19 = vmul.f32 %v890_v60, %v797_v16  ;;  %v1058_v62 = vpop.f32.mrb[5].mxu0 }
 0x250   : > { %v800_v63 = vpop.f32.mrb[6].mxu0 }
 0x251   : > { %v908_v1 = vmul.f32 %v895_v19, %v797_v16  ;;  %v1059_v4 = vpop.f32.mrb[7].mxu0  ;;  %v899_v2 = vadd.f32 %v898_v59, %v895_v19 }
 0x253   : > { %900 = vadd.xlane.f32.xlu0 %v899_v2  ;;  %v912_v3 = vadd.f32 %v911_v0, %v908_v1 }
 0x255   : > { %913 = vadd.xlane.f32.xlu1 %v912_v3 }
 0x2e0   : > { %v901_v61 = vpop.xlane.xlu0 %900 }
 0x2e1   : > { %903 = vst.msk [vmem:[%s181_s10] sm:$0xff] %vm902_vm9, %v901_v61 }
 0x2e2   : > { %v914_v5 = vpop.xlane.xlu1 %913 }
 0x2e3   : > { %915 = vst.msk [vmem:[%s185_s16] sm:$0xff] %vm902_vm9, %v914_v5 }
 0x2e4 PF: > { %s16_s12 = sadd.s32 1, %s1183_s12  }
 0x2e5   : > { %p13_p9 = scmp.ge.s32.totalorder %s16_s12, 6  }
 0x2e7   :  { %15 = sbr.rel (!%p13_p9) target bundleno = 2 (0x2), region = 77 }
 0x2ee   :  { %949 = vsyncpa [#allocation4], 1 }
 0x2ef   :  { %951 = vsyncpa [#allocation4 + $0x1], 1 }
 0x2f0   :  { %952 = vsyncpa [#allocation6], 1 }

</bundles_post_ra>
